<compile_context>
chip_gen: v5e
topology: v5e:2x2
jax: 0.10.0
libtpu: 0.0.40
codegen_flags: <defaults>
</compile_context>

<pallas_src>
import functools

import jax
import jax.numpy as jnp
from jax.experimental import pallas as pl
from jax.experimental.pallas import tpu as pltpu

IN_FEATURES = 2
HIDDEN_SIZES = [32, 16]
ACTIVATION = "relu"  # 'relu' or 'tanh'


def _act(x):
    if ACTIVATION == "relu":
        return jnp.maximum(x, 0.0)
    return jnp.tanh(x)


def _round_up(x, m):
    return ((x + m - 1) // m) * m


def _cdiv(a, b):
    return -(-a // b)


def selector_mlp_kernel(x_ref, w1_ref, w2_ref, w3_ref, b_ref, o_ref, *,
                        in_features, h1, h2):
    # x_ref : (in_features, TN)  feature-major tile of the input.
    # w1_ref: (h1, in_features)  (PyTorch weight layout, (out, in))
    # w2_ref: (h2, h1)
    # w3_ref: (1, h2)            PyTorch out-layer weight (row vector)
    # b_ref : (h1 + h2 + 1, 1)   fused biases [b1; b2; b3]
    # o_ref : (1, TN)            lane-dense scores

    w1 = w1_ref[...]                                   # (h1, in_features)

    # ---- Layer 1: K == in_features (tiny) -> VPU broadcast FMAs, no MXU. ----
    h = b_ref[0:h1, :]                                 # (h1, 1), lane-broadcasts
    for k in range(in_features):
        # (h1, 1) * (1, TN) -> (h1, TN)
        h = h + w1[:, k:k + 1] * x_ref[k:k + 1, :]
    h = _act(h)

    # ---- Layer 2: (h2, h1) @ (h1, TN) on the MXU (f32-faithful). ----
    h = jnp.dot(w2_ref[...], h,
                preferred_element_type=jnp.float32,
                precision=jax.lax.Precision.HIGHEST)
    h = _act(h + b_ref[h1:h1 + h2, :])

    # ---- Output layer (h2 -> 1): (1, h2) @ (h2, TN) on the MXU. ----
    out = jnp.dot(w3_ref[...], h,
                  preferred_element_type=jnp.float32,
                  precision=jax.lax.Precision.HIGHEST)          # (1, TN)
    out = out + b_ref[h1 + h2:h1 + h2 + 1, :]

    o_ref[...] = out.astype(o_ref.dtype)


def _vmem_limit_bytes(tn, h1, h2):
    # Double-buffered in/out tiles (sublane-padded to 8 rows) plus the
    # compiler-managed f32 intermediates ((h1,TN)+(h2,TN) with 2x headroom).
    tile_bufs = 2 * (8 * tn * 4) * 2
    intermediates = 4 * tn * 2 * (h1 + h2 + 2)
    total = tile_bufs + intermediates + (2 << 20)
    # Floor at 32 MiB (raises v5e's 16 MiB default scoped limit), cap at
    # 64 MiB (stays inside v7x's physical VMEM).
    return int(min(64 << 20, max(32 << 20, total)))


def selector_mlp_forward(x, params, *, tn=32768, feature_major=False):
    """Forward pass.

    x: (N, in_features) float32, or (in_features, N) if feature_major=True
       (supplying feature-major input upstream skips the transpose pass).
    Returns scores of shape (N,) float32.
    """
    if feature_major:
        in_f, n = x.shape
        x_fm = x
    else:
        n, in_f = x.shape
        x_fm = x.T  # one cheap transpose; prefer feature_major=True upstream.

    w1, b1, w2, b2, w3, b3 = params
    h1 = w1.shape[1]
    h2 = w2.shape[1]

    # ---- Tile selection: lane-dense, multiple of 128, balanced grid steps. ----
    n128 = _round_up(max(n, 1), 128)
    tn = max(128, _round_up(min(int(tn), n128), 128))
    num_tiles = _cdiv(n128, tn)
    tn = _round_up(_cdiv(n128, num_tiles), 128)   # rebalance -> minimal padding
    n_pad = num_tiles * tn

    x_fm_pad = jnp.pad(x_fm, ((0, 0), (0, n_pad - n)))

    # Weights in (out, in) orientation; biases fused into one column vector.
    w1_t = w1.T                                        # (h1, in_f)
    w2_t = w2.T                                        # (h2, h1)
    w3_r = w3.T                                        # (1, h2)
    b_all = jnp.concatenate(
        [b1.reshape(-1), b2.reshape(-1), b3.reshape(-1)]).reshape(-1, 1)

    grid = (num_tiles,)
    fixed = lambda i: (0, 0)   # resident weights: same block every grid step

    kernel = functools.partial(
        selector_mlp_kernel, in_features=in_f, h1=h1, h2=h2)

    flops = n_pad * (2 * in_f * h1 + 2 * h1 * h2 + 2 * h2)
    transcendentals = 0 if ACTIVATION == "relu" else n_pad * (h1 + h2)
    bytes_accessed = n_pad * (in_f * 4 + 4)

    out = pl.pallas_call(
        kernel,
        out_shape=jax.ShapeDtypeStruct((1, n_pad), jnp.float32),
        grid_spec=pl.GridSpec(
            grid=grid,
            in_specs=[
                pl.BlockSpec((in_f, tn), lambda i: (0, i)),    # x tile
                pl.BlockSpec((h1, in_f), fixed),               # W1 (out,in)
                pl.BlockSpec((h2, h1), fixed),                 # W2 (out,in)
                pl.BlockSpec((1, h2), fixed),                  # W3 row
                pl.BlockSpec((h1 + h2 + 1, 1), fixed),         # fused biases
            ],
            out_specs=pl.BlockSpec((1, tn), lambda i: (0, i)),
        ),
        compiler_params=pltpu.CompilerParams(
            dimension_semantics=("parallel",),
            vmem_limit_bytes=_vmem_limit_bytes(tn, h1, h2)),
        cost_estimate=pl.CostEstimate(
            flops=flops,
            transcendentals=transcendentals,
            bytes_accessed=bytes_accessed),
    )(x_fm_pad, w1_t, w2_t, w3_r, b_all)

    # .view(-1) in PyTorch -> drop column padding, return (N,).
    return out[0, :n]


def init_params(key, in_features=IN_FEATURES, hidden_sizes=HIDDEN_SIZES):
    """Deterministic init mimicking nn.Linear's U(-1/sqrt(fan_in), 1/sqrt(fan_in))."""
    params = []
    prev = in_features
    sizes = list(hidden_sizes) + [1]
    for h in sizes:
        key, kw, kb = jax.random.split(key, 3)
        bound = 1.0 / jnp.sqrt(jnp.float32(prev))
        # Stored as (in, out) == PyTorch weight (out, in) transposed.
        w = jax.random.uniform(kw, (prev, h), jnp.float32, -bound, bound)
        b = jax.random.uniform(kb, (1, h), jnp.float32, -bound, bound)
        params.extend([w, b])
        prev = h
    return tuple(params)


def selector_mlp_ref(x, params):
    """Pure-JAX reference of the PyTorch forward pass (f32-faithful dots)."""
    w1, b1, w2, b2, w3, b3 = params
    hp = jax.lax.Precision.HIGHEST
    h = _act(jnp.dot(x, w1, precision=hp) + b1)
    h = _act(jnp.dot(h, w2, precision=hp) + b2)
    return (jnp.dot(h, w3, precision=hp) + b3).reshape(-1)


if __name__ == "__main__":
    key = jax.random.PRNGKey(0)
    kp, kx1, kx2, kx3 = jax.random.split(key, 4)

    params = init_params(kp)

    # Small case (single lane-dense tile).
    N1 = 8
    x1 = jax.random.normal(kx1, (N1, IN_FEATURES), jnp.float32)
    s1 = jax.block_until_ready(selector_mlp_forward(x1, params))
    r1 = selector_mlp_ref(x1, params)
    assert s1.shape == (N1,)
    assert jnp.allclose(s1, r1, atol=1e-5, rtol=1e-5), (s1, r1)

    # Multi-block case (exercises the balanced lane-tiled grid / parallel axis).
    N2 = 1000
    x2 = jax.random.normal(kx2, (N2, IN_FEATURES), jnp.float32)
    s2 = jax.block_until_ready(selector_mlp_forward(x2, params, tn=256))
    r2 = selector_mlp_ref(x2, params)
    assert s2.shape == (N2,)
    assert jnp.allclose(s2, r2, atol=1e-5, rtol=1e-5), (s2, r2)

    # Feature-major input path (no wrapper transpose; preferred upstream layout).
    N3 = 4096
    x3_fm = jax.random.normal(kx3, (IN_FEATURES, N3), jnp.float32)
    s3 = jax.block_until_ready(
        selector_mlp_forward(x3_fm, params, feature_major=True))
    r3 = selector_mlp_ref(x3_fm.T, params)
    assert s3.shape == (N3,)
    assert jnp.allclose(s3, r3, atol=1e-5, rtol=1e-5), (s3, r3)

    # select_vertex equivalent (argmax of scores) — plain JAX glue.
    # TODO(synk): SelectorMLP.load (torch checkpoint I/O) is host-side and has
    # no kernel equivalent.
    _ = int(jnp.argmax(s1))

    print("KERNEL_OK")
</pallas_src>

<mosaic_0001>
module attributes {stable_mosaic.version = 11 : i64} {
  func.func @selector_mlp_kernel(%arg0: i32, %arg1: memref<2x128xf32, #tpu.memory_space<vmem>>, %arg2: memref<32x2xf32, #tpu.memory_space<vmem>>, %arg3: memref<16x32xf32, #tpu.memory_space<vmem>>, %arg4: memref<1x16xf32, #tpu.memory_space<vmem>>, %arg5: memref<49x1xf32, #tpu.memory_space<vmem>>, %arg6: memref<1x128xf32, #tpu.memory_space<vmem>>) attributes {dimension_semantics = [#tpu.dimension_semantics<parallel>], iteration_bounds = array<i64: 1>, scalar_prefetch = 0 : i64, scratch_operands = 0 : i64, tpu.core_type = #tpu.core_type<tc>, window_params = [{transform_indices = @transform_0, window_bounds = array<i64: 2, 128>}, {pipeline_mode = #tpu.pipeline_mode<synchronous>, transform_indices = @transform_1, window_bounds = array<i64: 32, 2>}, {pipeline_mode = #tpu.pipeline_mode<synchronous>, transform_indices = @transform_2, window_bounds = array<i64: 16, 32>}, {pipeline_mode = #tpu.pipeline_mode<synchronous>, transform_indices = @transform_3, window_bounds = array<i64: 1, 16>}, {pipeline_mode = #tpu.pipeline_mode<synchronous>, transform_indices = @transform_4, window_bounds = array<i64: 49, 1>}, {transform_indices = @transform_5, window_bounds = array<i64: 1, 128>}]} {
    %c0 = arith.constant 0 : index
    %c0_0 = arith.constant 0 : index
    %0 = vector.load %arg2[%c0, %c0_0] : memref<32x2xf32, #tpu.memory_space<vmem>>, vector<32x2xf32>
    %c0_1 = arith.constant 0 : index
    %c0_2 = arith.constant 0 : index
    %1 = vector.load %arg5[%c0_1, %c0_2] : memref<49x1xf32, #tpu.memory_space<vmem>>, vector<32x1xf32>
    %2 = vector.extract_strided_slice %0 {offsets = [0, 0], sizes = [32, 1], strides = [1, 1]} : vector<32x2xf32> to vector<32x1xf32>
    %c0_3 = arith.constant 0 : index
    %c0_4 = arith.constant 0 : index
    %3 = vector.load %arg1[%c0_3, %c0_4] : memref<2x128xf32, #tpu.memory_space<vmem>>, vector<1x128xf32>
    %4 = vector.broadcast %2 : vector<32x1xf32> to vector<32x128xf32>
    %5 = vector.broadcast %3 : vector<1x128xf32> to vector<32x128xf32>
    %6 = arith.mulf %4, %5 : vector<32x128xf32>
    %7 = vector.broadcast %1 : vector<32x1xf32> to vector<32x128xf32>
    %8 = arith.addf %7, %6 : vector<32x128xf32>
    %9 = vector.extract_strided_slice %0 {offsets = [0, 1], sizes = [32, 1], strides = [1, 1]} : vector<32x2xf32> to vector<32x1xf32>
    %c1 = arith.constant 1 : index
    %c0_5 = arith.constant 0 : index
    %10 = vector.load %arg1[%c1, %c0_5] : memref<2x128xf32, #tpu.memory_space<vmem>>, vector<1x128xf32>
    %11 = vector.broadcast %9 : vector<32x1xf32> to vector<32x128xf32>
    %12 = vector.broadcast %10 : vector<1x128xf32> to vector<32x128xf32>
    %13 = arith.mulf %11, %12 : vector<32x128xf32>
    %14 = arith.addf %8, %13 : vector<32x128xf32>
    %cst = arith.constant 0.000000e+00 : f32
    %15 = vector.broadcast %cst : f32 to vector<32x128xf32>
    %16 = arith.maximumf %14, %15 : vector<32x128xf32>
    %c0_6 = arith.constant 0 : index
    %c0_7 = arith.constant 0 : index
    %17 = vector.load %arg3[%c0_6, %c0_7] : memref<16x32xf32, #tpu.memory_space<vmem>>, vector<16x32xf32>
    %cst_8 = arith.constant dense<0.000000e+00> : vector<16x128xf32>
    %18 = tpu.matmul %17, %16, %cst_8 {dimension_numbers = #tpu.dot_dimension_numbers<[1], [0], [0], [1], [0, 0, 1, 1], [], []>, precision = #tpu.contract_precision<fp32>} : vector<16x32xf32>, vector<32x128xf32>, vector<16x128xf32> -> vector<16x128xf32>
    %c32 = arith.constant 32 : index
    %c0_9 = arith.constant 0 : index
    %19 = vector.load %arg5[%c32, %c0_9] : memref<49x1xf32, #tpu.memory_space<vmem>>, vector<16x1xf32>
    %20 = vector.broadcast %19 : vector<16x1xf32> to vector<16x128xf32>
    %21 = arith.addf %18, %20 : vector<16x128xf32>
    %cst_10 = arith.constant 0.000000e+00 : f32
    %22 = vector.broadcast %cst_10 : f32 to vector<16x128xf32>
    %23 = arith.maximumf %21, %22 : vector<16x128xf32>
    %c0_11 = arith.constant 0 : index
    %c0_12 = arith.constant 0 : index
    %24 = vector.load %arg4[%c0_11, %c0_12] : memref<1x16xf32, #tpu.memory_space<vmem>>, vector<1x16xf32>
    %cst_13 = arith.constant dense<0.000000e+00> : vector<1x128xf32>
    %25 = tpu.matmul %24, %23, %cst_13 {dimension_numbers = #tpu.dot_dimension_numbers<[1], [0], [0], [1], [0, 0, 1, 1], [], []>, precision = #tpu.contract_precision<fp32>} : vector<1x16xf32>, vector<16x128xf32>, vector<1x128xf32> -> vector<1x128xf32>
    %c48 = arith.constant 48 : index
    %c0_14 = arith.constant 0 : index
    %26 = vector.load %arg5[%c48, %c0_14] : memref<49x1xf32, #tpu.memory_space<vmem>>, vector<1x1xf32>
    %27 = vector.broadcast %26 : vector<1x1xf32> to vector<1x128xf32>
    %28 = arith.addf %25, %27 : vector<1x128xf32>
    %c0_15 = arith.constant 0 : index
    %c0_16 = arith.constant 0 : index
    %29 = vector.load %arg6[%c0_15, %c0_16] : memref<1x128xf32, #tpu.memory_space<vmem>>, vector<1x128xf32>
    tpu.vector_store %arg6[%c0_15, %c0_16], %28 {strides = array<i32>} : memref<1x128xf32, #tpu.memory_space<vmem>>, vector<1x128xf32>,
    return
  }
  func.func @transform_0(%arg0: i32) -> (i32, i32) {
    %c0_i32 = arith.constant 0 : i32
    %c0_i32_0 = arith.constant 0 : i32
    return %c0_i32, %arg0 : i32, i32
  }
  func.func @transform_1(%arg0: i32) -> (i32, i32) {
    %c0_i32 = arith.constant 0 : i32
    %c0_i32_0 = arith.constant 0 : i32
    %c0_i32_1 = arith.constant 0 : i32
    return %c0_i32, %c0_i32_0 : i32, i32
  }
  func.func @transform_2(%arg0: i32) -> (i32, i32) {
    %c0_i32 = arith.constant 0 : i32
    %c0_i32_0 = arith.constant 0 : i32
    %c0_i32_1 = arith.constant 0 : i32
    return %c0_i32, %c0_i32_0 : i32, i32
  }
  func.func @transform_3(%arg0: i32) -> (i32, i32) {
    %c0_i32 = arith.constant 0 : i32
    %c0_i32_0 = arith.constant 0 : i32
    %c0_i32_1 = arith.constant 0 : i32
    return %c0_i32, %c0_i32_0 : i32, i32
  }
  func.func @transform_4(%arg0: i32) -> (i32, i32) {
    %c0_i32 = arith.constant 0 : i32
    %c0_i32_0 = arith.constant 0 : i32
    %c0_i32_1 = arith.constant 0 : i32
    return %c0_i32, %c0_i32_0 : i32, i32
  }
  func.func @transform_5(%arg0: i32) -> (i32, i32) {
    %c0_i32 = arith.constant 0 : i32
    %c0_i32_0 = arith.constant 0 : i32
    return %c0_i32, %arg0 : i32, i32
  }
}

</mosaic_0001>

<bundles_post_ra>
// kernel: tpu_custom_call.1
= control target key start
LH: loop header
LB: loop body
LE: loop exit
PB: predicated region body
PF: predicated region fallthrough
CT: control target
= control target key end

     0   :  { %v575_v3 = vmov 0   ;;  %s673_s0 = inlined_call_operand.vmem [shape: f32[2,128], index: 0, kind: input, shape index: {}]   ;;  %s674_s1 = inlined_call_operand.vmem [shape: f32[32,2], index: 1, kind: input, shape index: {}]   ;;  %s675_s2 = inlined_call_operand.vmem [shape: f32[16,32], index: 2, kind: input, shape index: {}]   ;;  %s676_s3 = inlined_call_operand.vmem [shape: f32[1,16], index: 3, kind: input, shape index: {}]   ;;  %s677_s4 = inlined_call_operand.vmem [shape: f32[49,1], index: 4, kind: input, shape index: {}]   ;;  %s678_s5 = inlined_call_operand.hbm [shape: f32[1,128], index: 5, kind: output, shape index: {}]  }
   0x1   :  { %v28_v0 = vld [vmem:[%s677_s4 + $0x18] sm:$0xff]  ;;  %v22_v2 = vld [vmem:[%s674_s1 + $0x8] sm:$0xff]  ;;  %541 = vset.pattern.permute.xlu2 %v575_v3  ;;  %539 = vset.pattern.permute.xlu1 %v575_v3 }
   0x2   :  { %v24_v1 = vld [vmem:[%s674_s1 + $0x18] sm:$0xff]  ;;  %538 = vset.pattern.permute.xlu0 %v575_v3  ;;  %72 = vperm.xlu1 %539, %v28_v0  }
   0x3   :  { %47 = vperm.xlu0 %538, %v24_v1   ;;  %37 = vperm.xlu2 %541, %v22_v2  }
   0x4   :  { %10 = vsyncpa [#allocation3], 0  ;;  %v23_v4 = vld [vmem:[%s674_s1 + $0x10] sm:$0xff]  ;;  %v576_v6 = vmov 1   ;;  %v26_v7 = vld [vmem:[%s677_s4 + $0x8] sm:$0xff]  ;;  %vm123_vm0 = vcmask 261120  }
   0x5   :  { %v27_v5 = vld [vmem:[%s677_s4 + $0x10] sm:$0xff]  ;;  %v21_v8 = vld [vmem:[%s674_s1] sm:$0xff]  ;;  %v110_v37 = vld [vmem:[%s675_s2 + $0x8] sm:$0xff]  ;;  %vm355_vm1 = vcmask 130048   ;;  %s526_s24 = sshll.u32 %s678_s5, 4  ;;  %s527_s24 = int_to_ptr.hbm [resolvable:$true] %s526_s24 }
   0x6   :  { %v25_v9 = vld [vmem:[%s677_s4] sm:$0xff]  ;;  %v128_v45 = vsel %vm123_vm0, %v110_v37, 0  ;;  %v112_v63 = vld [vmem:[%s677_s4 + $0x28] sm:$0xff] }
   0x7   :  { %v111_v10 = vld [vmem:[%s677_s4 + $0x20] sm:$0xff]  ;;  %v158_v53 = vand.u32 4294901760, %v128_v45 }
   0x8   :  { %v547_v14 = vld [vmem:[%s673_s0] ss:$0 sm:$0xff]  ;;  %v548_v17 = vld [vmem:[%s673_s0 + $0x1] ss:$0 sm:$0xff] }
   0x9   :  { %v109_v23 = vld [vmem:[%s675_s2] sm:$0xff]  ;;  %v159_v62 = vsub.f32 %v128_v45, %v158_v53 }
   0xa   :  { %540 = vset.pattern.permute.xlu1 %v576_v6  ;;  %v125_v28 = vsel %vm123_vm0, %v109_v23, 0 }
   0xb   :  { %42 = vperm.xlu0 %538, %v23_v4   ;;  %67 = vperm.xlu2 %541, %v27_v5   ;;  %v650_v34 = vand.u32 4294901760, %v125_v28 }
   0xc   :  { %93 = vperm.xlu1 %540, %v24_v1  }
   0xd   :  { %v151_v41 = vsub.f32 %v125_v28, %v650_v34  ;;  %v348_v28 = vld [vmem:[%s676_s3] sm:$0x1]  ;;  %s577_s3 = smov [#allocation2]  }
   0xf   :  { %v152_v52 = vand.u32 4294901760, %v151_v41 }
  0x11   :  { %v153_v61 = vsub.f32 %v151_v41, %v152_v52 }
  0x13   :  { %542 = vset.pattern.permute.xlu0 %v576_v6  ;;  %62 = vperm.xlu2 %541, %v26_v7   ;;  %v154_v5 = vand.u32 4294901760, %v153_v61 }
  0x14   :  { %543 = vset.pattern.permute.xlu1 %v575_v3  ;;  %89 = vperm.xlu0 %542, %v23_v4  }
  0x15   :  { %32 = vperm.xlu1 %543, %v21_v8  }
  0x1b   :  { %57 = vperm.xlu2 %541, %v25_v9  }
  0x1c   :  { %81 = vperm.xlu0 %542, %v21_v8  }
  0x1d   :  { %544 = vset.pattern.permute.xlu1 %v576_v6  ;;  %v160_v6 = vand.u32 4294901760, %v159_v62 }
  0x1e   :  { %85 = vperm.xlu1 %544, %v22_v2  }
  0x23   :  { %115 = vperm.xlu2 %541, %v111_v10   ;;  %v161_v10 = vsub.f32 %v159_v62, %v160_v6 }
  0x24   :  { %546 = vset.pattern.permute.xlu0 %v575_v3 }
  0x26   :  { %545 = vset.pattern.permute.xlu1 %v575_v3 }
  0x27   :  { %120 = vperm.xlu1 %545, %v112_v63  }
  0x5d   :  { %v38_v11 = vpop.permute.xlu2 %37 }
  0x5e   :  { %v52_v42 = vmul.f32 %v547_v14, %v38_v11 }
  0x65   :  { %v68_v15 = vpop.permute.xlu2 %67 }
  0x6d   :  { %v63_v26 = vpop.permute.xlu2 %62 }
  0x6e   :  { %v76_v54 = vadd.f32 %v63_v26, %v52_v42  ;;  %v349_v42 = vld [vmem:[%s677_s4 + $0x30] sm:$0x1]  ;;  %s524_s4 = sshll.u32 %s577_s3, 4  ;;  %s525_s4 = int_to_ptr.vmem [resolvable:$true] %s524_s4 }
  0x6f   :  { %352 = vperm.xlu0 %546, %v349_v42  }
  0x74   :  { %v73_v12 = vpop.permute.xlu1 %72 }
  0x75   :  { %v48_v13 = vpop.permute.xlu0 %47  ;;  %v58_v46 = vpop.permute.xlu2 %57 }
  0x76   :  { %v54_v16 = vmul.f32 %v547_v14, %v48_v13 }
  0x78   :  { %v78_v20 = vadd.f32 %v73_v12, %v54_v16 }
  0x7d   :  { %v43_v18 = vpop.permute.xlu0 %42 }
  0x7e   :  { %v94_v19 = vpop.permute.xlu1 %93  ;;  %v53_v24 = vmul.f32 %v547_v14, %v43_v18 }
  0x7f   :  { %v100_v21 = vmul.f32 %v548_v17, %v94_v19  ;;  %v116_v19 = vpop.permute.xlu2 %115 }
  0x80   :  { %v77_v30 = vadd.f32 %v68_v15, %v53_v24 }
  0x81   :  { %v104_v22 = vadd.f32 %v100_v21, %v78_v20 }
  0x83   :  { %v108_v25 = vmax.f32 %v104_v22, 0.0 }
  0x85   :  { %v644_v27 = vand.u32 4294901760, %v108_v25 }
  0x86   :  { %v90_v29 = vpop.permute.xlu0 %89 }
  0x87   :  { %v99_v31 = vmul.f32 %v548_v17, %v90_v29  ;;  %143 = vmatpush.msra.mxu0 %v644_v27  ;;  %260 = vmatpush.msra.mxu3 %v644_v27  ;;  %v33_v32 = vpop.permute.xlu1 %32  ;;  %v180_v33 = vsub.f32 %v108_v25, %v644_v27 }
  0x88   :  { %v51_v39 = vmul.f32 %v547_v14, %v33_v32  ;;  %v162_v14 = vand.u32 4294901760, %v161_v10 }
  0x89   :  { %v103_v35 = vadd.f32 %v99_v31, %v77_v30  ;;  %226 = vmatpush.msra.mxu2 %v180_v33  ;;  %v181_v36 = vand.u32 4294901760, %v180_v33  ;;  %v357_v30 = vsel %vm355_vm1, %v348_v28, 0 }
  0x8a   :  { %v75_v48 = vadd.f32 %v58_v46, %v51_v39 }
  0x8b   :  { %v107_v38 = vmax.f32 %v103_v35, 0.0  ;;  %v182_v40 = vsub.f32 %v180_v33, %v181_v36  ;;  %v377_v35 = vand.u32 4294901760, %v357_v30 }
  0x8d   :  { %v144_v43 = vand.u32 4294901760, %v107_v38  ;;  %v183_v44 = vand.u32 4294901760, %v182_v40 }
  0x8e   :  { %v82_v47 = vpop.permute.xlu0 %81 }
  0x8f   :  { %v97_v49 = vmul.f32 %v548_v17, %v82_v47  ;;  %145 = vmatpush.msra.mxu0 %v144_v43  ;;  %184 = vmatpush.msra.mxu1 %v183_v44  ;;  %v186_v50 = vsub.f32 %v107_v38, %v144_v43 }
  0x90   :  { %262 = vmatpush.msra.mxu3 %v144_v43  ;;  %v86_v51 = vpop.permute.xlu1 %85 }
  0x91   :  { %v101_v55 = vadd.f32 %v97_v49, %v75_v48  ;;  %v98_v56 = vmul.f32 %v548_v17, %v86_v51  ;;  %229 = vmatpush.msra.mxu2 %v186_v50  ;;  %v187_v57 = vand.u32 4294901760, %v186_v50 }
  0x93   :  { %v105_v58 = vmax.f32 %v101_v55, 0.0  ;;  %v102_v59 = vadd.f32 %v98_v56, %v76_v54  ;;  %v188_v60 = vsub.f32 %v186_v50, %v187_v57 }
  0x95   :  { %v148_v0 = vand.u32 4294901760, %v105_v58  ;;  %v106_v1 = vmax.f32 %v102_v59, 0.0  ;;  %v189_v2 = vand.u32 4294901760, %v188_v60 }
  0x97   :  { %v146_v3 = vand.u32 4294901760, %v106_v1  ;;  %190 = vmatpush.msra.mxu1 %v189_v2  ;;  %v198_v4 = vsub.f32 %v105_v58, %v148_v0 }
  0x99   :  { %147 = vmatpush.msra.mxu0 %v146_v3  ;;  %264 = vmatpush.msra.mxu3 %v146_v3  ;;  %v192_v7 = vsub.f32 %v106_v1, %v146_v3  ;;  %v199_v8 = vand.u32 4294901760, %v198_v4  ;;  %v121_v23 = vpop.permute.xlu1 %120 }
  0x9b   :  { %149 = vmatpush.msra.mxu0 %v148_v0  ;;  %232 = vmatpush.msra.mxu2 %v192_v7  ;;  %v193_v9 = vand.u32 4294901760, %v192_v7  ;;  %v200_v12 = vsub.f32 %v198_v4, %v199_v8 }
  0x9c   :  { %266 = vmatpush.msra.mxu3 %v148_v0  ;;  %155 = vmatmul.f32.vlgmr.msra.gmra.mxu0 %v154_v5 }
  0x9d   :  { %295 = vmatpush.msrb.mxu0 %v181_v36  ;;  %235 = vmatpush.msra.mxu2 %v198_v4  ;;  %v194_v11 = vsub.f32 %v192_v7, %v193_v9  ;;  %v201_v15 = vand.u32 4294901760, %v200_v12 }
  0x9e   :  { %238 = vmatmul.f32.vlgmr.msra.gmra.mxu2 %v151_v41  ;;  %270 = vmatmul.f32.vlgmr.msra.gmra.mxu3 %v152_v52  ;;  %v378_v41 = vsub.f32 %v357_v30, %v377_v35 }
  0x9f   :  { %299 = vmatpush.msrb.mxu0 %v187_v57  ;;  %v195_v13 = vand.u32 4294901760, %v194_v11 }
  0xa0   :  { %v379_v47 = vand.u32 4294901760, %v378_v41 }
  0xa1   :  { %303 = vmatpush.msrb.mxu0 %v193_v9  ;;  %196 = vmatpush.msra.mxu1 %v195_v13 }
  0xa2   :  { %v380_v52 = vsub.f32 %v378_v41, %v379_v47 }
  0xa3   :  { %307 = vmatpush.msrb.mxu0 %v199_v8  ;;  %202 = vmatpush.msra.mxu1 %v201_v15 }
  0xa4   :  { %163 = vmatmul.f32.gmra.mxu0 %v162_v14  ;;  %204 = vmatmul.f32.vlgmr.msra.gmra.mxu1 %v650_v34  ;;  %v381_v56 = vand.u32 4294901760, %v380_v52 }
  0xa5   :  { %330 = vmatpush.msrb.mxu1 %v644_v27 }
  0xa6   :  { %243 = vmatmul.f32.gmra.mxu2 %v159_v62  ;;  %276 = vmatmul.f32.gmra.mxu3 %v160_v6 }
  0xa7   :  { %332 = vmatpush.msrb.mxu1 %v144_v43 }
  0xa9   :  { %334 = vmatpush.msrb.mxu1 %v146_v3 }
  0xab   :  { %336 = vmatpush.msrb.mxu1 %v148_v0 }
  0xac   :  { %208 = vmatmul.f32.gmra.mxu1 %v158_v53  ;;  %309 = vmatmul.f32.vlgmr.msrb.gmra.mxu0 %v650_v34 }
  0xb4   :  { %313 = vmatmul.f32.gmra.mxu0 %v158_v53  ;;  %338 = vmatmul.f32.vlgmr.msrb.gmra.mxu1 %v650_v34 }
  0xbc   :  { %342 = vmatmul.f32.gmra.mxu1 %v158_v53 }
  0xe1   :  { %v353_v63 = vpop.permute.xlu0 %352 }
 0x119   :  { %v156_v16 = vpop.f32.mrf.mxu0 }
 0x11a   :  { %v157_v20 = vadd.f32 %v156_v16, %v116_v19 }
 0x121   :  { %v164_v17 = vpop.f32.mrf.mxu0  ;;  %v205_v18 = vpop.f32.mrf.mxu1 }
 0x122   :  { %v239_v21 = vpop.f32.mrf.mxu2  ;;  %v206_v22 = vadd.f32 %v205_v18, %v157_v20  ;;  %v271_v24 = vpop.f32.mrf.mxu3  ;;  %v165_v27 = vadd.f32 %v164_v17, %v121_v23 }
 0x124   :  { %v240_v26 = vadd.f32 %v239_v21, %v206_v22 }
 0x126   :  { %v272_v31 = vadd.f32 %v271_v24, %v240_v26 }
 0x129   :  { %v209_v25 = vpop.f32.mrf.mxu1  ;;  %v310_v29 = vpop.f32.mrf.mxu0 }
 0x12a   :  { %v210_v32 = vadd.f32 %v209_v25, %v165_v27  ;;  %v244_v33 = vpop.f32.mrf.mxu2  ;;  %v311_v34 = vadd.f32 %v310_v29, %v272_v31  ;;  %v277_v39 = vpop.f32.mrf.mxu3 }
 0x12c   :  { %v245_v37 = vadd.f32 %v244_v33, %v210_v32 }
 0x12e   :  { %v278_v44 = vadd.f32 %v277_v39, %v245_v37 }
 0x131   :  { %v339_v36 = vpop.f32.mrf.mxu1  ;;  %v314_v43 = vpop.f32.mrf.mxu0 }
 0x132   :  { %v340_v38 = vadd.f32 %v339_v36, %v311_v34  ;;  %v315_v45 = vadd.f32 %v314_v43, %v278_v44 }
 0x134   :  { %v346_v40 = vmax.f32 %v340_v38, 0.0 }
 0x136   :  { %v375_v46 = vand.u32 4294901760, %v346_v40 }
 0x138   :  { %v407_v50 = vsub.f32 %v346_v40, %v375_v46 }
 0x139   :  { %v343_v48 = vpop.f32.mrf.mxu1 }
 0x13a   :  { %v344_v49 = vadd.f32 %v343_v48, %v315_v45  ;;  %v408_v55 = vand.u32 4294901760, %v407_v50 }
 0x13c   :  { %v347_v51 = vmax.f32 %v344_v49, 0.0  ;;  %v409_v59 = vsub.f32 %v407_v50, %v408_v55 }
 0x13e   :  { %v373_v53 = vand.u32 4294901760, %v347_v51  ;;  %v410_v61 = vand.u32 4294901760, %v409_v59 }
 0x140   :  { %v401_v54 = vsub.f32 %v347_v51, %v373_v53  ;;  %374 = vmatpush.msrb.mxu2 %v373_v53  ;;  %510 = vmatpush.msra.mxu1 %v373_v53 }
 0x142   :  { %376 = vmatpush.msrb.mxu2 %v375_v46  ;;  %512 = vmatpush.msra.mxu1 %v375_v46  ;;  %v402_v57 = vand.u32 4294901760, %v401_v54 }
 0x143   :  { %514 = vmatmul.f32.vlgmr.msra.gmra.mxu1 %v377_v35  ;;  %382 = vmatmul.f32.vlgmr.msrb.gmra.mxu2 %v381_v56 }
 0x144   :  { %433 = vmatpush.msra.mxu2 %v401_v54  ;;  %485 = vmatpush.msra.mxu0 %v402_v57  ;;  %v403_v58 = vsub.f32 %v401_v54, %v402_v57 }
 0x146   :  { %436 = vmatpush.msra.mxu2 %v407_v50  ;;  %489 = vmatpush.msra.mxu0 %v408_v55  ;;  %v404_v60 = vand.u32 4294901760, %v403_v58 }
 0x147   :  { %491 = vmatmul.f32.vlgmr.msra.gmra.mxu0 %v377_v35 }
 0x148   :  { %405 = vmatpush.msrb.mxu3 %v404_v60 }
 0x14a   :  { %411 = vmatpush.msrb.mxu3 %v410_v61 }
 0x14b   :  { %413 = vmatmul.f32.vlgmr.msrb.gmra.mxu3 %v377_v35  ;;  %439 = vmatmul.f32.vlgmr.msra.gmra.mxu2 %v378_v41 }
 0x14c   :  { %458 = vmatpush.msra.mxu3 %v373_v53 }
 0x14e   :  { %460 = vmatpush.msra.mxu3 %v375_v46 }
 0x153   :  { %464 = vmatmul.f32.vlgmr.msra.gmra.mxu3 %v379_v47 }
 0x1c0   :  { %v515_v8 = vpop.f32.mrf.mxu1 }
 0x1c4   :  { %v492_v6 = vpop.f32.mrf.mxu0 }
 0x1c6   :  { %v383_v62 = vpop.f32.mrf.mxu2 }
 0x1c7   :  { %v384_v0 = vadd.f32 %v383_v62, %v353_v63 }
 0x1ce   :  { %v414_v1 = vpop.f32.mrf.mxu3  ;;  %v440_v3 = vpop.f32.mrf.mxu2 }
 0x1cf   :  { %v415_v2 = vadd.f32 %v414_v1, %v384_v0 }
 0x1d1   :  { %v441_v4 = vadd.f32 %v440_v3, %v415_v2 }
 0x1d6   :  { %v465_v5 = vpop.f32.mrf.mxu3 }
 0x1d7   :  { %v466_v7 = vadd.f32 %v465_v5, %v441_v4 }
 0x1d9   :  { %v493_v9 = vadd.f32 %v492_v6, %v466_v7 }
 0x1db   :  { %v516_v10 = vadd.f32 %v515_v8, %v493_v9 }
 0x1dd   :  { %518 = vst [vmem:[#allocation2] sm:$0x1] %v516_v10 }
 0x1de   :  { %529 = dma.vmem_to_hbm [thread:$0]  %s525_s4, 16, %s527_s24, [#allocation3]  }
 0x1df   :  { %573 = dma.done.wait [#allocation3], 16  }
 0x1e0   :  { %574 = vsyncadd [#allocation3], 4294967280 }
 0x1e1   :  { %534 = vsyncpa [#allocation3], 1 }

</bundles_post_ra>
